<compile_context>
chip_gen: v7x
topology: tpu7x:2x2x1
jax: 0.10.0
libtpu: 0.0.40
codegen_flags: <defaults>
</compile_context>

<pallas_src>
import functools
import math

import jax
import jax.numpy as jnp
from jax import lax
from jax.experimental import pallas as pl
from jax.experimental.pallas import tpu as pltpu


def _sdpa_kernel(q_ref, k_ref, v_ref, o_ref, s_ref, *, scale):
    # q_ref: (G, TQ, D); k_ref/v_ref: (G, L, D); o_ref: (G, TQ, D); s_ref: (G, TQ, L)
    # Fold the 1/sqrt(D) scale into q (TQ*D multiplies instead of TQ*L on scores).
    q = q_ref[...] * jnp.asarray(scale, q_ref.dtype)
    k = k_ref[...]
    v = v_ref[...]

    # scores[g, q, k] = sum_d q[g, q, d] * k[g, k, d]   (no explicit transpose)
    scores = lax.dot_general(
        q, k,
        dimension_numbers=(((2,), (2,)), ((0,), (0,))),
        preferred_element_type=jnp.float32,
    )  # (G, TQ, L) float32

    # Numerically stable softmax along the key axis. `score` is a visible
    # module output, so the normalization uses an exact divide (no approx EUP
    # reciprocal on an externally returned tensor).
    m = jnp.max(scores, axis=-1, keepdims=True)
    p = jnp.exp(scores - m)
    denom = jnp.sum(p, axis=-1, keepdims=True)
    p = p / denom

    s_ref[...] = p.astype(s_ref.dtype)

    # out[g, q, d] = sum_k p[g, q, k] * v[g, k, d]
    out = lax.dot_general(
        p.astype(v.dtype), v,
        dimension_numbers=(((2,), (1,)), ((0,), (0,))),
        preferred_element_type=jnp.float32,
    )
    o_ref[...] = out.astype(o_ref.dtype)


def _vmem_budget():
    """Generation-aware (block_budget_bytes, vmem_limit_bytes)."""
    try:
        cap = int(pltpu.get_tpu_info().vmem_capacity_bytes)
    except Exception:
        cap = 64 * 1024 * 1024  # v7x-safe default (smallest per-TC VMEM)
    # ~96 MiB limit on 128 MiB chips (v5e/v6e), 48 MiB on 64 MiB chips (v7x).
    vmem_limit = min((cap * 3) // 4, 100 * 1024 * 1024)
    # Double-buffered block target ~45% of the limit (leaves compiler scratch).
    block_budget = (vmem_limit * 9) // 20
    return block_budget, vmem_limit


def _pick_tiles(BH, L, D, in_dtype, score_dtype, budget_bytes):
    """Pick (head-group size G, query tile TQ) so one double-buffered block
    (k/v full-L, q/o/score query-tiled) stays under `budget_bytes`."""
    in_sz = jnp.dtype(in_dtype).itemsize
    sc_sz = jnp.dtype(score_dtype).itemsize
    sublane = max(8, 32 // max(in_sz, 1))  # 8 for f32, 16 for bf16

    # Query-tile candidates, biggest-preferred. 512/256 keep the MXU M dim
    # full-width on v6e/v7x; then 128; then any sublane-multiple divisor of L;
    # full L as the last resort (always legal: block dim == array dim).
    cands = []
    for t in (512, 256, 128):
        if t <= L and L % t == 0:
            cands.append(t)
    cands.extend(sorted(
        (d for d in range(sublane, min(L, 1024) + 1, sublane) if L % d == 0),
        reverse=True))
    cands.append(L)
    tq_list, seen = [], set()
    for t in cands:
        if t not in seen:
            seen.add(t)
            tq_list.append(t)

    g_divs = sorted((d for d in range(1, BH + 1) if BH % d == 0), reverse=True)

    def block_bytes(g, tq):
        kv = 2 * g * L * D * in_sz        # k, v (full key length, resident)
        qo = 2 * g * tq * D * in_sz       # q in, attention-out
        sc = g * tq * L * sc_sz           # score out block
        return 2 * (kv + qo + sc)         # x2 for double-buffering

    for tq in tq_list:                    # prefer larger TQ
        for g in g_divs:                  # then the largest G that fits
            if block_bytes(g, tq) <= budget_bytes:
                return g, tq
    # Nothing fits the budget: smallest legal block; the raised vmem limit may
    # still absorb it (graceful degradation rather than silent over-allocation).
    return 1, min(tq_list)


def scale_dot_product_attention(g, e_tild, x_tild, *, score_dtype=None,
                                compute_dtype=None):
    """Pallas implementation of ScaleDotProductAttention.forward (mask=None).

    Args:
      g, e_tild, x_tild: (B, H, L, D) arrays.
      score_dtype: dtype of the returned score (default: input dtype, matching
        the PyTorch module's contract).
      compute_dtype: optional dtype (e.g. jnp.bfloat16) to cast q/k/v for the
        MXU matmuls and DMAs; default None keeps the input dtype.
    Returns:
      (x_out, score): x_out (B, H, L, D) in g.dtype, score (B, H, L, L).
    """
    B, H, L, D = g.shape
    BH = B * H
    scale = 1.0 / math.sqrt(D)
    out_dtype = g.dtype
    score_dtype = jnp.dtype(score_dtype) if score_dtype is not None else jnp.dtype(g.dtype)

    q = g.reshape(BH, L, D)
    k = e_tild.reshape(BH, L, D)
    v = x_tild.reshape(BH, L, D)
    if compute_dtype is not None and jnp.dtype(compute_dtype) != q.dtype:
        q = q.astype(compute_dtype)
        k = k.astype(compute_dtype)
        v = v.astype(compute_dtype)

    block_budget, vmem_limit = _vmem_budget()
    G, TQ = _pick_tiles(BH, L, D, q.dtype, score_dtype, block_budget)

    in_sz = jnp.dtype(q.dtype).itemsize
    cost = pl.CostEstimate(
        flops=4 * BH * L * L * D,
        transcendentals=BH * L * L,
        bytes_accessed=(3 * BH * L * D * in_sz                       # q, k, v
                        + BH * L * D * jnp.dtype(out_dtype).itemsize  # out
                        + BH * L * L * score_dtype.itemsize),         # score
    )

    kernel = functools.partial(_sdpa_kernel, scale=scale)

    out, score = pl.pallas_call(
        kernel,
        out_shape=(
            jax.ShapeDtypeStruct((BH, L, D), out_dtype),
            jax.ShapeDtypeStruct((BH, L, L), score_dtype),
        ),
        grid_spec=pltpu.PrefetchScalarGridSpec(
            num_scalar_prefetch=0,
            grid=(BH // G, L // TQ),   # head groups leading: k/v reused across j
            in_specs=[
                pl.BlockSpec((G, TQ, D), lambda i, j: (i, j, 0)),   # q: query-tiled
                pl.BlockSpec((G, L, D), lambda i, j: (i, 0, 0)),    # k: full length
                pl.BlockSpec((G, L, D), lambda i, j: (i, 0, 0)),    # v: full length
            ],
            out_specs=[
                pl.BlockSpec((G, TQ, D), lambda i, j: (i, j, 0)),   # attention output
                pl.BlockSpec((G, TQ, L), lambda i, j: (i, j, 0)),   # score (lane-dense last dim)
            ],
        ),
        compiler_params=pltpu.CompilerParams(
            dimension_semantics=("parallel", "parallel"),
            vmem_limit_bytes=vmem_limit,
        ),
        cost_estimate=cost,
    )(q, k, v)

    return out.reshape(B, H, L, D), score.reshape(B, H, L, L)


def _reference(g, e_tild, x_tild):
    D = g.shape[-1]
    score = jnp.einsum("bhqd,bhkd->bhqk", g, e_tild,
                       precision=jax.lax.Precision.HIGHEST) / math.sqrt(D)
    score = jax.nn.softmax(score, axis=-1)
    out = jnp.einsum("bhqk,bhkd->bhqd", score, x_tild,
                     precision=jax.lax.Precision.HIGHEST)
    return out, score


if __name__ == "__main__":
    B, H, L, D = 2, 4, 8, 32
    key = jax.random.PRNGKey(0)
    kg, ke, kx = jax.random.split(key, 3)
    g = jax.random.normal(kg, (B, H, L, D), dtype=jnp.float32)
    e_tild = jax.random.normal(ke, (B, H, L, D), dtype=jnp.float32)
    x_tild = jax.random.normal(kx, (B, H, L, D), dtype=jnp.float32)

    out, score = scale_dot_product_attention(g, e_tild, x_tild)
    out, score = jax.block_until_ready((out, score))

    ref_out, ref_score = _reference(g, e_tild, x_tild)
    # Tolerance covers possible lower-precision MXU passes for the f32 matmuls
    # inside the kernel (D=32) vs the precision="highest" reference; the softmax
    # normalization itself is exact.
    assert jnp.allclose(out, ref_out, atol=2e-2, rtol=2e-2), "out mismatch"
    assert jnp.allclose(score, ref_score, atol=2e-2, rtol=2e-2), "score mismatch"

    print("KERNEL_OK")
</pallas_src>

<mosaic_0001>
module attributes {stable_mosaic.version = 11 : i64} {
  func.func @_sdpa_kernel(%arg0: i32, %arg1: i32, %arg2: memref<8x8x32xf32, #tpu.memory_space<vmem>>, %arg3: memref<8x8x32xf32, #tpu.memory_space<vmem>>, %arg4: memref<8x8x32xf32, #tpu.memory_space<vmem>>, %arg5: memref<8x8x32xf32, #tpu.memory_space<vmem>>, %arg6: memref<8x8x8xf32, #tpu.memory_space<vmem>>) attributes {dimension_semantics = [#tpu.dimension_semantics<parallel>, #tpu.dimension_semantics<parallel>], iteration_bounds = array<i64: 1, 1>, scalar_prefetch = 0 : i64, scratch_operands = 0 : i64, tpu.core_type = #tpu.core_type<tc>, window_params = [{transform_indices = @transform_0, window_bounds = array<i64: 8, 8, 32>}, {transform_indices = @transform_1, window_bounds = array<i64: 8, 8, 32>}, {transform_indices = @transform_2, window_bounds = array<i64: 8, 8, 32>}, {transform_indices = @transform_3, window_bounds = array<i64: 8, 8, 32>}, {transform_indices = @transform_4, window_bounds = array<i64: 8, 8, 8>}]} {
    %c0 = arith.constant 0 : index
    %c0_0 = arith.constant 0 : index
    %c0_1 = arith.constant 0 : index
    %0 = vector.load %arg2[%c0, %c0_0, %c0_1] : memref<8x8x32xf32, #tpu.memory_space<vmem>>, vector<8x8x32xf32>
    %cst = arith.constant 0.176776692 : f32
    %1 = vector.broadcast %cst : f32 to vector<8x8x32xf32>
    %2 = arith.mulf %0, %1 : vector<8x8x32xf32>
    %c0_2 = arith.constant 0 : index
    %c0_3 = arith.constant 0 : index
    %c0_4 = arith.constant 0 : index
    %3 = vector.load %arg3[%c0_2, %c0_3, %c0_4] : memref<8x8x32xf32, #tpu.memory_space<vmem>>, vector<8x8x32xf32>
    %c0_5 = arith.constant 0 : index
    %c0_6 = arith.constant 0 : index
    %c0_7 = arith.constant 0 : index
    %4 = vector.load %arg4[%c0_5, %c0_6, %c0_7] : memref<8x8x32xf32, #tpu.memory_space<vmem>>, vector<8x8x32xf32>
    %cst_8 = arith.constant dense<0.000000e+00> : vector<8x8x8xf32>
    %5 = tpu.matmul %2, %3, %cst_8 {dimension_numbers = #tpu.dot_dimension_numbers<[2], [2], [1], [1], [0, 0, 0, 1, 1, 1], [0], [0]>} : vector<8x8x32xf32>, vector<8x8x32xf32>, vector<8x8x8xf32> -> vector<8x8x8xf32>
    %cst_9 = arith.constant dense<0xFF800000> : vector<8x8xf32>
    %6 = vector.multi_reduction <maximumf>, %5, %cst_9 [2] : vector<8x8x8xf32> to vector<8x8xf32>
    %7 = vector.shape_cast %6 : vector<8x8xf32> to vector<8x8x1xf32>
    %8 = vector.broadcast %7 : vector<8x8x1xf32> to vector<8x8x8xf32>
    %9 = arith.subf %5, %8 : vector<8x8x8xf32>
    %10 = math.exp %9 : vector<8x8x8xf32>
    %cst_10 = arith.constant dense<0.000000e+00> : vector<8x8xf32>
    %11 = vector.multi_reduction <add>, %10, %cst_10 [2] : vector<8x8x8xf32> to vector<8x8xf32>
    %12 = vector.shape_cast %11 : vector<8x8xf32> to vector<8x8x1xf32>
    %13 = vector.broadcast %12 : vector<8x8x1xf32> to vector<8x8x8xf32>
    %14 = arith.divf %10, %13 : vector<8x8x8xf32>
    %c0_11 = arith.constant 0 : index
    %c0_12 = arith.constant 0 : index
    %c0_13 = arith.constant 0 : index
    %15 = vector.load %arg6[%c0_11, %c0_12, %c0_13] : memref<8x8x8xf32, #tpu.memory_space<vmem>>, vector<8x8x8xf32>
    tpu.vector_store %arg6[%c0_11, %c0_12, %c0_13], %14 {strides = array<i32>} : memref<8x8x8xf32, #tpu.memory_space<vmem>>, vector<8x8x8xf32>,
    %cst_14 = arith.constant dense<0.000000e+00> : vector<8x8x32xf32>
    %16 = tpu.matmul %14, %4, %cst_14 {dimension_numbers = #tpu.dot_dimension_numbers<[2], [1], [1], [2], [0, 0, 0, 1, 1, 2], [0], [0]>} : vector<8x8x8xf32>, vector<8x8x32xf32>, vector<8x8x32xf32> -> vector<8x8x32xf32>
    %c0_15 = arith.constant 0 : index
    %c0_16 = arith.constant 0 : index
    %c0_17 = arith.constant 0 : index
    %17 = vector.load %arg5[%c0_15, %c0_16, %c0_17] : memref<8x8x32xf32, #tpu.memory_space<vmem>>, vector<8x8x32xf32>
    tpu.vector_store %arg5[%c0_15, %c0_16, %c0_17], %16 {strides = array<i32>} : memref<8x8x32xf32, #tpu.memory_space<vmem>>, vector<8x8x32xf32>,
    return
  }
  func.func @transform_0(%arg0: i32, %arg1: i32) -> (i32, i32, i32) {
    %c0_i32 = arith.constant 0 : i32
    %c0_i32_0 = arith.constant 0 : i32
    return %arg0, %arg1, %c0_i32 : i32, i32, i32
  }
  func.func @transform_1(%arg0: i32, %arg1: i32) -> (i32, i32, i32) {
    %c0_i32 = arith.constant 0 : i32
    %c0_i32_0 = arith.constant 0 : i32
    %c0_i32_1 = arith.constant 0 : i32
    return %arg0, %c0_i32, %c0_i32_0 : i32, i32, i32
  }
  func.func @transform_2(%arg0: i32, %arg1: i32) -> (i32, i32, i32) {
    %c0_i32 = arith.constant 0 : i32
    %c0_i32_0 = arith.constant 0 : i32
    %c0_i32_1 = arith.constant 0 : i32
    return %arg0, %c0_i32, %c0_i32_0 : i32, i32, i32
  }
  func.func @transform_3(%arg0: i32, %arg1: i32) -> (i32, i32, i32) {
    %c0_i32 = arith.constant 0 : i32
    %c0_i32_0 = arith.constant 0 : i32
    return %arg0, %arg1, %c0_i32 : i32, i32, i32
  }
  func.func @transform_4(%arg0: i32, %arg1: i32) -> (i32, i32, i32) {
    %c0_i32 = arith.constant 0 : i32
    %c0_i32_0 = arith.constant 0 : i32
    return %arg0, %arg1, %c0_i32 : i32, i32, i32
  }
}

</mosaic_0001>

<bundles_post_ra>
// kernel: tpu_custom_call.1
= control target key start
LH: loop header
LB: loop body
LE: loop exit
PB: predicated region body
PF: predicated region fallthrough
CT: control target
= control target key end

     0   :  { %10 = vsyncpa [#allocation3], 0  ;;  %s1950_s0 = inlined_call_operand.hbm [shape: f32[8,8,32], index: 0, kind: input, shape index: {}]   ;;  %s1951_s1 = inlined_call_operand.hbm [shape: f32[8,8,32], index: 1, kind: input, shape index: {}]   ;;  %s1952_s2 = inlined_call_operand.hbm [shape: f32[8,8,32], index: 2, kind: input, shape index: {}]   ;;  %s1953_s3 = inlined_call_operand.hbm [shape: f32[8,8,32], index: 3, kind: output, shape index: {0}]   ;;  %s1954_s4 = inlined_call_operand.hbm [shape: f32[8,8,8], index: 4, kind: output, shape index: {1}]  }
   0x1   :  { %11 = vsyncpa [#allocation6], 0 }
   0x2   :  { %12 = vsyncpa [#allocation4], 0 }
   0x3   :  { %13 = vsyncpa [#allocation10], 0  ;;  %s1718_s15 = smov [#allocation5]   ;;  %s1719_s17 = smov [#allocation2]  }
   0x4   :  { %s31_s16 = sshll.u32 %s1718_s15, 4  ;;  %s19_s18 = sshll.u32 %s1719_s17, 4  ;;  %s32_s16 = int_to_ptr.vmem [resolvable:$true] %s31_s16  ;;  %s1752_s18 = int_to_ptr.vmem [resolvable:$true] %s19_s18 }
   0x5   :  { %s1600_s21 = scalar_lea.hbm %s1951_s1, 1024 }
   0x6   :  { %p1601_p0 = scmp.ne.s32.totalorder %s1951_s1, %s1600_s21  ;;  %p1604_p1 = scmp.lt.u32.totalorder %s1600_s21, %s1951_s1 }
   0x8   :  { %p1606_p2 = pnand %p1604_p1, %p1601_p0 }
   0xa   :  { %1609 = shalt.err (!%p1606_p2)
}
   0xb   :  { %s1610_s26 = scalar_lea.vmem %s32_s16, 1024  ;;  %p1615_p4 = scmp.lt.s32.totalorder %s32_s16, %s32_s16 }
   0xc   :  { %p1611_p3 = scmp.ne.s32.totalorder %s32_s16, %s1610_s26  ;;  %p1616_p5 = scmp.lt.s32.totalorder %s1610_s26, %s1610_s26 }
   0xe   :  { %p1617_p6 = por %p1616_p5, %p1615_p4 }
  0x10   :  { %p1618_p7 = pnand %p1617_p6, %p1611_p3 }
  0x12   :  { %1621 = shalt.err (!%p1618_p7)
}
  0x13   :  { %s1720_s27 = smov 128   ;;  %s1721_s28 = smov 8  }
  0x14   :  { %37 = dma.hbm_to_vmem [thread:$0]  %s1951_s1, 1024, %s32_s16, [#allocation6], %s1720_s27, %s1720_s27, %s1721_s28  }
  0x15   :  { %s1622_s7 = scalar_lea.hbm %s1950_s0, 1024 }
  0x16   :  { %p1623_p8 = scmp.ne.s32.totalorder %s1950_s0, %s1622_s7  ;;  %p1626_p9 = scmp.lt.u32.totalorder %s1622_s7, %s1950_s0 }
  0x18   :  { %p1628_p10 = pnand %p1626_p9, %p1623_p8 }
  0x1a   :  { %1631 = shalt.err (!%p1628_p10)
}
  0x1b   :  { %s1632_s12 = scalar_lea.vmem %s1752_s18, 1024  ;;  %p1637_p12 = scmp.lt.s32.totalorder %s1752_s18, %s1752_s18 }
  0x1c   :  { %p1633_p11 = scmp.ne.s32.totalorder %s1752_s18, %s1632_s12  ;;  %p1638_p13 = scmp.lt.s32.totalorder %s1632_s12, %s1632_s12 }
  0x1e   :  { %p1639_p0 = por %p1638_p13, %p1637_p12 }
  0x20   :  { %p1640_p1 = pnand %p1639_p0, %p1633_p11 }
  0x22   :  { %1643 = shalt.err (!%p1640_p1)
}
  0x23   :  { %25 = dma.hbm_to_vmem [thread:$0]  %s1950_s0, 1024, %s1752_s18, [#allocation3], %s1720_s27, %s1720_s27, %s1721_s28  }
  0x24   :  { %s1722_s14 = smov [#allocation7]   ;;  %s1644_s19 = scalar_lea.hbm %s1952_s2, 1024 }
  0x25   :  { %s43_s15 = sshll.u32 %s1722_s14, 4  ;;  %p1645_p2 = scmp.ne.s32.totalorder %s1952_s2, %s1644_s19  ;;  %s44_s15 = int_to_ptr.vmem [resolvable:$true] %s43_s15 }
  0x26   :  { %p1648_p3 = scmp.lt.u32.totalorder %s1644_s19, %s1952_s2 }
  0x28   :  { %p1650_p4 = pnand %p1648_p3, %p1645_p2 }
  0x2a   :  { %1653 = shalt.err (!%p1650_p4)
}
  0x2b   :  { %s1654_s24 = scalar_lea.vmem %s44_s15, 1024  ;;  %p1659_p6 = scmp.lt.s32.totalorder %s44_s15, %s44_s15 }
  0x2c   :  { %p1655_p5 = scmp.ne.s32.totalorder %s44_s15, %s1654_s24  ;;  %p1660_p7 = scmp.lt.s32.totalorder %s1654_s24, %s1654_s24 }
  0x2e   :  { %p1661_p8 = por %p1660_p7, %p1659_p6 }
  0x30   :  { %p1662_p9 = pnand %p1661_p8, %p1655_p5 }
  0x32   :  { %1665 = shalt.err (!%p1662_p9)
}
  0x33   :  { %49 = dma.hbm_to_vmem [thread:$0]  %s1952_s2, 1024, %s44_s15, [#allocation6], %s1720_s27, %s1720_s27, %s1721_s28  }
  0x34   :  { %1710 = dma.done.wait [#allocation3], 1024  }
  0x35   :  { %1711 = vsyncadd [#allocation3], 4294966272 }
  0x36   :  { %1712 = dma.done.wait [#allocation6], 2048  }
  0x37   :  { %1713 = vsyncadd [#allocation6], 4294965248  ;;  %v1723_v0 = vmov 0.0   ;;  %vm1724_vm0 = vmmov 0   ;;  %vm91_vm1 = vcmask 261120   ;;  %v75_v1 = vld [vmem:[#allocation5] sm:$0xff] }
  0x38   :  { %1479 = vmatprep.subr.mxu0 %v1723_v0  ;;  %1481 = vmatprep.mubr.msk.f32.mxu0 %vm1724_vm0, %v1723_v0  ;;  %v59_v2 = vld [vmem:[#allocation2] sm:$0xff]  ;;  %v76_v3 = vld [vmem:[#allocation5 + $0x8] sm:$0xff]  ;;  %v61_v6 = vld [vmem:[#allocation2 + $0x10] sm:$0xff]  ;;  %vm700_vm2 = vcmask 64512   ;;  %s1725_s2 = smov [#allocation9]  }
  0x39   :  { %1484 = vmatprep.subr.mxu1 %v1723_v0  ;;  %1486 = vmatprep.mubr.msk.f32.mxu1 %vm1724_vm0, %v1723_v0  ;;  %v67_v4 = vmul.f32 0.17677669, %v59_v2  ;;  %v60_v5 = vld [vmem:[#allocation2 + $0x8] sm:$0xff]  ;;  %v77_v7 = vld [vmem:[#allocation5 + $0x10] sm:$0xff]  ;;  %v78_v9 = vld [vmem:[#allocation5 + $0x18] sm:$0xff]  ;;  %s1406_s25 = sshll.u32 %s1725_s2, 4  ;;  %s1407_s25 = int_to_ptr.vmem [resolvable:$true] %s1406_s25 }
  0x3a   :  { %1480 = vmatpush3.xpose.msk.msra.mxu0 %vm91_vm1, %v75_v1  ;;  %1485 = vmatpush3.xpose.msk.msra.mxu1 %vm91_vm1, %v76_v3  ;;  %v68_v8 = vmul.f32 0.17677669, %v60_v5  ;;  %v62_v10 = vld [vmem:[#allocation2 + $0x18] sm:$0xff]  ;;  %v69_v11 = vmul.f32 0.17677669, %v61_v6  ;;  %v63_v12 = vld [vmem:[#allocation2 + $0x20] sm:$0xff]  ;;  %p1671_p11 = scmp.lt.s32.totalorder %s1407_s25, %s1407_s25 }
  0x3b   :  { %1489 = vmatprep.subr.mxu0 %v1723_v0  ;;  %1494 = vmatprep.subr.mxu1 %v1723_v0  ;;  %v79_v13 = vld [vmem:[#allocation5 + $0x20] sm:$0xff]  ;;  %v70_v14 = vmul.f32 0.17677669, %v62_v10  ;;  %v64_v15 = vld [vmem:[#allocation2 + $0x28] sm:$0xff]  ;;  %v71_v16 = vmul.f32 0.17677669, %v63_v12 }
  0x3c   :  { %v80_v17 = vld [vmem:[#allocation5 + $0x28] sm:$0xff]  ;;  %v65_v18 = vld [vmem:[#allocation2 + $0x30] sm:$0xff]  ;;  %v72_v20 = vmul.f32 0.17677669, %v64_v15  ;;  %v66_v21 = vld [vmem:[#allocation2 + $0x38] sm:$0xff]  ;;  %s1666_s26 = scalar_lea.vmem %s1407_s25, 1024 }
  0x3d   :  { %1482 = vmatmul.mubr.msk.f32.vlgmr.msra.gmra.mrb[0].mxu0 %vm91_vm1, %v67_v4  ;;  %1487 = vmatmul.mubr.msk.f32.vlgmr.msra.gmra.mrb[0].mxu1 %vm91_vm1, %v68_v8  ;;  %v81_v19 = vld [vmem:[#allocation5 + $0x30] sm:$0xff]  ;;  %v73_v22 = vmul.f32 0.17677669, %v65_v18  ;;  %v82_v23 = vld [vmem:[#allocation5 + $0x38] sm:$0xff]  ;;  %v74_v24 = vmul.f32 0.17677669, %v66_v21  ;;  %p1667_p10 = scmp.ne.s32.totalorder %s1407_s25, %s1666_s26  ;;  %p1672_p12 = scmp.lt.s32.totalorder %s1666_s26, %s1666_s26 }
  0x3e   :  { %1490 = vmatpush3.xpose.msk.msra.mxu0 %vm91_vm1, %v77_v7  ;;  %1491 = vmatprep.mubr.msk.f32.mxu0 %vm1724_vm0, %v1723_v0 }
  0x3f   :  { %1499 = vmatprep.subr.mxu0 %v1723_v0  ;;  %1495 = vmatpush3.xpose.msk.msra.mxu1 %vm91_vm1, %v78_v9  ;;  %p1673_p13 = por %p1672_p12, %p1671_p11 }
  0x40   :  { %1496 = vmatprep.mubr.msk.f32.mxu1 %vm1724_vm0, %v1723_v0  ;;  %1504 = vmatprep.subr.mxu1 %v1723_v0 }
  0x41   :  { %1492 = vmatmul.mubr.msk.f32.vlgmr.msra.gmra.mrb[2].mxu0 %vm91_vm1, %v69_v11  ;;  %p1674_p0 = pnand %p1673_p13, %p1667_p10 }
  0x42   :  { %1500 = vmatpush3.xpose.msk.msra.mxu0 %vm91_vm1, %v79_v13  ;;  %1501 = vmatprep.mubr.msk.f32.mxu0 %vm1724_vm0, %v1723_v0 }
  0x43   :  { %1497 = vmatmul.mubr.msk.f32.vlgmr.msra.gmra.mrb[2].mxu1 %vm91_vm1, %v70_v14  ;;  %1509 = vmatprep.subr.mxu0 %v1723_v0 }
  0x44   :  { %1505 = vmatpush3.xpose.msk.msra.mxu1 %vm91_vm1, %v80_v17  ;;  %1506 = vmatprep.mubr.msk.f32.mxu1 %vm1724_vm0, %v1723_v0 }
  0x45   :  { %1502 = vmatmul.mubr.msk.f32.vlgmr.msra.gmra.mrb[4].mxu0 %vm91_vm1, %v71_v16  ;;  %1514 = vmatprep.subr.mxu1 %v1723_v0 }
  0x46   :  { %1510 = vmatpush3.xpose.msk.msra.mxu0 %vm91_vm1, %v81_v19  ;;  %1511 = vmatprep.mubr.msk.f32.mxu0 %vm1724_vm0, %v1723_v0 }
  0x47   :  { %1507 = vmatmul.mubr.msk.f32.vlgmr.msra.gmra.mrb[4].mxu1 %vm91_vm1, %v72_v20  ;;  %1519 = vmatprep.subr.mxu0 %v1723_v0 }
  0x48   :  { %1515 = vmatpush3.xpose.msk.msra.mxu1 %vm91_vm1, %v82_v23  ;;  %1516 = vmatprep.mubr.msk.f32.mxu1 %vm1724_vm0, %v1723_v0 }
  0x49   :  { %1512 = vmatmul.mubr.msk.f32.vlgmr.msra.gmra.mrb[6].mxu0 %vm91_vm1, %v73_v22  ;;  %1524 = vmatprep.subr.mxu1 %v1723_v0 }
  0x4a   :  { %1521 = vmatprep.mubr.msk.f32.mxu0 %vm1724_vm0, %v1723_v0 }
  0x4b   :  { %1517 = vmatmul.mubr.msk.f32.vlgmr.msra.gmra.mrb[6].mxu1 %vm91_vm1, %v74_v24 }
  0x4c   :  { %1526 = vmatprep.mubr.msk.f32.mxu1 %vm1724_vm0, %v1723_v0 }
 0x110   :  { %v164_v25 = vpop.f32.mrb[0].mxu0  ;;  %v240_v26 = vpop.f32.mrb[0].mxu1 }
 0x111   :  { %v1483_v27 = vpop.f32.mrb[1].mxu0  ;;  %v701_v28 = vsel %vm700_vm2, %v164_v25, -inf  ;;  %v1488_v29 = vpop.f32.mrb[1].mxu1  ;;  %v704_v30 = vsel %vm700_vm2, %v240_v26, -inf }
 0x112   :  { %702 = vmax.xlane.f32.xlu0 %v701_v28  ;;  %v84_v27 = vld [vmem:[#allocation7 + $0x8] sm:$0xff] }
 0x113   :  { %1525 = vmatpush3.msra.mxu1 %v84_v27 }
 0x114   :  { %v316_v31 = vpop.f32.mrb[2].mxu0  ;;  %1534 = vmatprep.subr.mxu1 %v1723_v0 }
 0x115   :  { %v1493_v32 = vpop.f32.mrb[3].mxu0  ;;  %v707_v33 = vsel %vm700_vm2, %v316_v31, -inf }
 0x116   :  { %705 = vmax.xlane.f32.xlu0 %v704_v30  ;;  %708 = vmax.xlane.f32.xlu1 %v707_v33  ;;  %v392_v34 = vpop.f32.mrb[2].mxu1 }
 0x117   :  { %v1498_v35 = vpop.f32.mrb[3].mxu1  ;;  %v710_v36 = vsel %vm700_vm2, %v392_v34, -inf }
 0x118   :  { %v468_v37 = vpop.f32.mrb[4].mxu0 }
 0x119   :  { %v713_v38 = vsel %vm700_vm2, %v468_v37, -inf  ;;  %v1503_v39 = vpop.f32.mrb[5].mxu0 }
 0x11a   :  { %711 = vmax.xlane.f32.xlu1 %v710_v36  ;;  %714 = vmax.xlane.f32.xlu0 %v713_v38  ;;  %v544_v40 = vpop.f32.mrb[4].mxu1  ;;  %v85_v36 = vld [vmem:[#allocation7 + $0x10] sm:$0xff] }
 0x11b   :  { %v1508_v41 = vpop.f32.mrb[5].mxu1  ;;  %v716_v42 = vsel %vm700_vm2, %v544_v40, -inf }
 0x11c   :  { %v620_v43 = vpop.f32.mrb[6].mxu0 }
 0x11d   :  { %v719_v44 = vsel %vm700_vm2, %v620_v43, -inf  ;;  %v1513_v45 = vpop.f32.mrb[7].mxu0 }
 0x11e   :  { %717 = vmax.xlane.f32.xlu1 %v716_v42  ;;  %720 = vmax.xlane.f32.xlu0 %v719_v44  ;;  %v696_v46 = vpop.f32.mrb[6].mxu1  ;;  %v86_v42 = vld [vmem:[#allocation7 + $0x18] sm:$0xff]  ;;  %v87_v44 = vld [vmem:[#allocation7 + $0x20] sm:$0xff] }
 0x11f   :  { %v1518_v47 = vpop.f32.mrb[7].mxu1  ;;  %v722_v48 = vsel %vm700_vm2, %v696_v46, -inf }
 0x122   :  { %723 = vmax.xlane.f32.xlu1 %v722_v48  ;;  %v88_v48 = vld [vmem:[#allocation7 + $0x28] sm:$0xff] }
 0x19f   :  { %v703_v49 = vpop.xlane.xlu0 %702 }
 0x1a0   :  { %v725_v50 = vsub.f32 %v164_v25, %v703_v49 }
 0x1a2   :  { %v733_v51 = vmul.f32 1.442695, %v725_v50  ;;  %v89_v50 = vld [vmem:[#allocation7 + $0x30] sm:$0xff] }
 0x1a3   :  { %v706_v52 = vpop.xlane.xlu0 %705  ;;  %v709_v53 = vpop.xlane.xlu1 %708 }
 0x1a4   :  { %1568 = vpow2.f32 %v733_v51  ;;  %v726_v54 = vsub.f32 %v240_v26, %v706_v52  ;;  %v727_v55 = vsub.f32 %v316_v31, %v709_v53  ;;  %v83_v26 = vld [vmem:[#allocation7] sm:$0xff] }
 0x1a5   :  { %1520 = vmatpush3.msra.mxu0 %v83_v26 }
 0x1a6   :  { %v735_v56 = vmul.f32 1.442695, %v726_v54  ;;  %v737_v57 = vmul.f32 1.442695, %v727_v55  ;;  %1529 = vmatprep.subr.mxu0 %v1723_v0  ;;  %v90_v54 = vld [vmem:[#allocation7 + $0x38] sm:$0xff] }
 0x1a7   :  { %v712_v58 = vpop.xlane.xlu1 %711  ;;  %v715_v59 = vpop.xlane.xlu0 %714 }
 0x1a8   :  { %1570 = vpow2.f32 %v735_v56  ;;  %v728_v60 = vsub.f32 %v392_v34, %v712_v58  ;;  %v729_v61 = vsub.f32 %v468_v37, %v715_v59 }
 0x1a9   :  { %1572 = vpow2.f32 %v737_v57 }
 0x1aa   :  { %v739_v62 = vmul.f32 1.442695, %v728_v60  ;;  %v741_v63 = vmul.f32 1.442695, %v729_v61 }
 0x1ab   :  { %v718_v1 = vpop.xlane.xlu1 %717  ;;  %v721_v2 = vpop.xlane.xlu0 %720 }
 0x1ac   :  { %1574 = vpow2.f32 %v739_v62  ;;  %v730_v3 = vsub.f32 %v544_v40, %v718_v1  ;;  %v731_v4 = vsub.f32 %v620_v43, %v721_v2 }
 0x1ad   :  { %1576 = vpow2.f32 %v741_v63 }
 0x1ae   :  { %v1569_v5 = vpop.eup %1568  ;;  %v743_v6 = vmul.f32 1.442695, %v730_v3  ;;  %v745_v7 = vmul.f32 1.442695, %v731_v4 }
 0x1af   :  { %v724_v8 = vpop.xlane.xlu1 %723  ;;  %v749_v9 = vsel %vm700_vm2, %v1569_v5, 0.0 }
 0x1b0   :  { %1578 = vpow2.f32 %v743_v6  ;;  %v732_v10 = vsub.f32 %v696_v46, %v724_v8  ;;  %750 = vadd.xlane.f32.xlu0 %v749_v9 }
 0x1b1   :  { %1580 = vpow2.f32 %v745_v7 }
 0x1b2   :  { %v1571_v11 = vpop.eup %1570  ;;  %v747_v12 = vmul.f32 1.442695, %v732_v10 }
 0x1b3   :  { %v1573_v13 = vpop.eup %1572  ;;  %v752_v14 = vsel %vm700_vm2, %v1571_v11, 0.0 }
 0x1b4   :  { %1582 = vpow2.f32 %v747_v12  ;;  %753 = vadd.xlane.f32.xlu1 %v752_v14  ;;  %v755_v15 = vsel %vm700_vm2, %v1573_v13, 0.0 }
 0x1b5   :  { %756 = vadd.xlane.f32.xlu0 %v755_v15 }
 0x1b6   :  { %v1575_v16 = vpop.eup %1574 }
 0x1b7   :  { %v1577_v17 = vpop.eup %1576  ;;  %v758_v18 = vsel %vm700_vm2, %v1575_v16, 0.0 }
 0x1b8   :  { %759 = vadd.xlane.f32.xlu1 %v758_v18  ;;  %v761_v19 = vsel %vm700_vm2, %v1577_v17, 0.0 }
 0x1b9   :  { %762 = vadd.xlane.f32.xlu0 %v761_v19 }
 0x1ba   :  { %v1863_v20 = vpop.eup %1578 }
 0x1bb   :  { %v1865_v21 = vpop.eup %1580  ;;  %v764_v22 = vsel %vm700_vm2, %v1863_v20, 0.0 }
 0x1bc   :  { %765 = vadd.xlane.f32.xlu1 %v764_v22  ;;  %v767_v23 = vsel %vm700_vm2, %v1865_v21, 0.0 }
 0x1bd   :  { %768 = vadd.xlane.f32.xlu0 %v767_v23 }
 0x1be   :  { %v1871_v24 = vpop.eup %1582 }
 0x1bf   :  { %v770_v25 = vsel %vm700_vm2, %v1871_v24, 0.0 }
 0x1c0   :  { %771 = vadd.xlane.f32.xlu1 %v770_v25 }
 0x23d   :  { %v751_v28 = vpop.xlane.xlu0 %750 }
 0x23e   :  { %1584 = vrcp.f32 %v751_v28 }
 0x241   :  { %v754_v29 = vpop.xlane.xlu1 %753 }
 0x242   :  { %1586 = vrcp.f32 %v754_v29  ;;  %v757_v30 = vpop.xlane.xlu0 %756 }
 0x243   :  { %1588 = vrcp.f32 %v757_v30 }
 0x245   :  { %v760_v31 = vpop.xlane.xlu1 %759 }
 0x246   :  { %1590 = vrcp.f32 %v760_v31  ;;  %v763_v32 = vpop.xlane.xlu0 %762 }
 0x247   :  { %1592 = vrcp.f32 %v763_v32 }
 0x248   :  { %v1585_v33 = vpop.eup %1584 }
 0x249   :  { %v774_v34 = vmul.f32 %v1585_v33, %v1569_v5  ;;  %v766_v35 = vpop.xlane.xlu1 %765 }
 0x24a   :  { %1594 = vrcp.f32 %v766_v35  ;;  %v769_v37 = vpop.xlane.xlu0 %768 }
 0x24b   :  { %789 = vst.msk [vmem:[#allocation9] sm:$0xff] %vm700_vm2, %v774_v34  ;;  %1596 = vrcp.f32 %v769_v37  ;;  %1522 = vmatmul.mubr.msk.f32.vlgmr.msra.gmra.mrb[8].mxu0 %vm700_vm2, %v774_v34 }
 0x24c   :  { %v1587_v38 = vpop.eup %1586  ;;  %1530 = vmatpush3.msra.mxu0 %v85_v36  ;;  %1531 = vmatprep.mubr.msk.f32.mxu0 %vm1724_vm0, %v1723_v0 }
 0x24d   :  { %v1589_v39 = vpop.eup %1588  ;;  %v776_v40 = vmul.f32 %v1587_v38, %v1571_v11  ;;  %v772_v41 = vpop.xlane.xlu1 %771  ;;  %1539 = vmatprep.subr.mxu0 %v1723_v0 }
 0x24e   :  { %v778_v43 = vmul.f32 %v1589_v39, %v1573_v13  ;;  %1598 = vrcp.f32 %v772_v41 }
 0x24f   :  { %790 = vst.msk [vmem:[#allocation9 + $0x8] sm:$0xff] %vm700_vm2, %v776_v40  ;;  %1527 = vmatmul.mubr.msk.f32.vlgmr.msra.gmra.mrb[8].mxu1 %vm700_vm2, %v776_v40 }
 0x250   :  { %v1591_v45 = vpop.eup %1590  ;;  %791 = vst.msk [vmem:[#allocation9 + $0x10] sm:$0xff] %vm700_vm2, %v778_v43  ;;  %1532 = vmatmul.mubr.msk.f32.vlgmr.msra.gmra.mrb[10].mxu0 %vm700_vm2, %v778_v43  ;;  %1535 = vmatpush3.msra.mxu1 %v86_v42 }
 0x251   :  { %v1593_v46 = vpop.eup %1592  ;;  %v780_v47 = vmul.f32 %v1591_v45, %v1575_v16  ;;  %1536 = vmatprep.mubr.msk.f32.mxu1 %vm1724_vm0, %v1723_v0  ;;  %1540 = vmatpush3.msra.mxu0 %v87_v44 }
 0x252   :  { %v782_v49 = vmul.f32 %v1593_v46, %v1577_v17  ;;  %1541 = vmatprep.mubr.msk.f32.mxu0 %vm1724_vm0, %v1723_v0  ;;  %1544 = vmatprep.subr.mxu1 %v1723_v0 }
 0x253   :  { %792 = vst.msk [vmem:[#allocation9 + $0x18] sm:$0xff] %vm700_vm2, %v780_v47  ;;  %1537 = vmatmul.mubr.msk.f32.vlgmr.msra.gmra.mrb[10].mxu1 %vm700_vm2, %v780_v47  ;;  %1549 = vmatprep.subr.mxu0 %v1723_v0 }
 0x254   :  { %v1595_v51 = vpop.eup %1594  ;;  %793 = vst.msk [vmem:[#allocation9 + $0x20] sm:$0xff] %vm700_vm2, %v782_v49  ;;  %1542 = vmatmul.mubr.msk.f32.vlgmr.msra.gmra.mrb[12].mxu0 %vm700_vm2, %v782_v49  ;;  %1545 = vmatpush3.msra.mxu1 %v88_v48 }
 0x255   :  { %v1597_v52 = vpop.eup %1596  ;;  %v784_v53 = vmul.f32 %v1595_v51, %v1863_v20  ;;  %1546 = vmatprep.mubr.msk.f32.mxu1 %vm1724_vm0, %v1723_v0  ;;  %1550 = vmatpush3.msra.mxu0 %v89_v50 }
 0x256   :  { %v786_v55 = vmul.f32 %v1597_v52, %v1865_v21  ;;  %1551 = vmatprep.mubr.msk.f32.mxu0 %vm1724_vm0, %v1723_v0  ;;  %1554 = vmatprep.subr.mxu1 %v1723_v0 }
 0x257   :  { %794 = vst.msk [vmem:[#allocation9 + $0x28] sm:$0xff] %vm700_vm2, %v784_v53  ;;  %1547 = vmatmul.mubr.msk.f32.vlgmr.msra.gmra.mrb[12].mxu1 %vm700_vm2, %v784_v53 }
 0x258   :  { %v1599_v56 = vpop.eup %1598  ;;  %795 = vst.msk [vmem:[#allocation9 + $0x30] sm:$0xff] %vm700_vm2, %v786_v55  ;;  %1552 = vmatmul.mubr.msk.f32.vlgmr.msra.gmra.mrb[14].mxu0 %vm700_vm2, %v786_v55  ;;  %1555 = vmatpush3.msra.mxu1 %v90_v54 }
 0x259   :  { %v788_v57 = vmul.f32 %v1599_v56, %v1871_v24  ;;  %1556 = vmatprep.mubr.msk.f32.mxu1 %vm1724_vm0, %v1723_v0 }
 0x25b   :  { %796 = vst.msk [vmem:[#allocation9 + $0x38] sm:$0xff] %vm700_vm2, %v788_v57  ;;  %1557 = vmatmul.mubr.msk.f32.vlgmr.msra.gmra.mrb[14].mxu1 %vm700_vm2, %v788_v57 }
 0x25c   :  { %1677 = shalt.err (!%p1674_p0)
}
 0x25d   :  { %s1678_s5 = scalar_lea.hbm %s1954_s4, 1024 }
 0x25e   :  { %p1679_p1 = scmp.ne.s32.totalorder %s1954_s4, %s1678_s5  ;;  %p1682_p2 = scmp.lt.u32.totalorder %s1678_s5, %s1954_s4 }
 0x260   :  { %p1684_p3 = pnand %p1682_p2, %p1679_p1 }
 0x262   :  { %1687 = shalt.err (!%p1684_p3)
}
 0x263   :  { %1412 = dma.vmem_to_hbm [thread:$0]  %s1407_s25, 1024, %s1954_s4, [#allocation10], %s1720_s27, %s1720_s27, %s1721_s28  }
 0x264   :  { %s1726_s4 = smov [#allocation8]  }
 0x265   :  { %s1394_s12 = sshll.u32 %s1726_s4, 4  ;;  %s1395_s12 = int_to_ptr.vmem [resolvable:$true] %s1394_s12 }
 0x266   :  { %s1688_s1 = scalar_lea.vmem %s1395_s12, 1024  ;;  %p1693_p5 = scmp.lt.s32.totalorder %s1395_s12, %s1395_s12 }
 0x267   :  { %p1689_p4 = scmp.ne.s32.totalorder %s1395_s12, %s1688_s1  ;;  %p1694_p6 = scmp.lt.s32.totalorder %s1688_s1, %s1688_s1 }
 0x269   :  { %p1695_p7 = por %p1694_p6, %p1693_p5 }
 0x26b   :  { %p1696_p8 = pnand %p1695_p7, %p1689_p4 }
 0x31e   :  { %v866_v0 = vpop.f32.mrb[8].mxu0 }
 0x31f   :  { %1381 = vst.msk [vmem:[#allocation8] sm:$0xff] %vm91_vm1, %v866_v0  ;;  %v1523_v58 = vpop.f32.mrb[9].mxu0 }
 0x322   :  { %v939_v59 = vpop.f32.mrb[8].mxu1 }
 0x323   :  { %1382 = vst.msk [vmem:[#allocation8 + $0x8] sm:$0xff] %vm91_vm1, %v939_v59  ;;  %v1012_v60 = vpop.f32.mrb[10].mxu0  ;;  %v1528_v61 = vpop.f32.mrb[9].mxu1 }
 0x324   :  { %1383 = vst.msk [vmem:[#allocation8 + $0x10] sm:$0xff] %vm91_vm1, %v1012_v60  ;;  %v1533_v62 = vpop.f32.mrb[11].mxu0 }
 0x326   :  { %v1085_v63 = vpop.f32.mrb[10].mxu1 }
 0x327   :  { %1384 = vst.msk [vmem:[#allocation8 + $0x18] sm:$0xff] %vm91_vm1, %v1085_v63  ;;  %v1158_v1 = vpop.f32.mrb[12].mxu0  ;;  %v1538_v2 = vpop.f32.mrb[11].mxu1 }
 0x328   :  { %1385 = vst.msk [vmem:[#allocation8 + $0x20] sm:$0xff] %vm91_vm1, %v1158_v1  ;;  %v1543_v3 = vpop.f32.mrb[13].mxu0 }
 0x32a   :  { %v1231_v4 = vpop.f32.mrb[12].mxu1 }
 0x32b   :  { %1386 = vst.msk [vmem:[#allocation8 + $0x28] sm:$0xff] %vm91_vm1, %v1231_v4  ;;  %v1304_v5 = vpop.f32.mrb[14].mxu0  ;;  %v1548_v6 = vpop.f32.mrb[13].mxu1 }
 0x32c   :  { %1387 = vst.msk [vmem:[#allocation8 + $0x30] sm:$0xff] %vm91_vm1, %v1304_v5  ;;  %v1553_v7 = vpop.f32.mrb[15].mxu0 }
 0x32e   :  { %v1377_v8 = vpop.f32.mrb[14].mxu1 }
 0x32f   :  { %1388 = vst.msk [vmem:[#allocation8 + $0x38] sm:$0xff] %vm91_vm1, %v1377_v8  ;;  %v1558_v9 = vpop.f32.mrb[15].mxu1 }
 0x330   :  { %1699 = shalt.err (!%p1696_p8)
}
 0x331   :  { %s1700_s15 = scalar_lea.hbm %s1953_s3, 1024 }
 0x332   :  { %p1701_p9 = scmp.ne.s32.totalorder %s1953_s3, %s1700_s15  ;;  %p1704_p10 = scmp.lt.u32.totalorder %s1700_s15, %s1953_s3 }
 0x334   :  { %p1706_p11 = pnand %p1704_p10, %p1701_p9 }
 0x336   :  { %1709 = shalt.err (!%p1706_p11)
}
 0x337   :  { %1400 = dma.vmem_to_hbm [thread:$0]  %s1395_s12, 1024, %s1953_s3, [#allocation4], %s1720_s27, %s1720_s27, %s1721_s28  }
 0x338   :  { %1714 = dma.done.wait [#allocation4], 1024  }
 0x339   :  { %1715 = vsyncadd [#allocation4], 4294966272 }
 0x33a   :  { %1716 = dma.done.wait [#allocation10], 1024  }
 0x33b   :  { %1717 = vsyncadd [#allocation10], 4294966272 }
 0x33c   :  { %1419 = vsyncpa [#allocation3], 1 }
 0x33d   :  { %1420 = vsyncpa [#allocation6], 1 }
 0x33e   :  { %1421 = vsyncpa [#allocation4], 1 }
 0x33f   :  { %1422 = vsyncpa [#allocation10], 1 }

</bundles_post_ra>
